<compile_context>
chip_gen: v6e
topology: v6e:2x2x1
jax: 0.10.0
libtpu: 0.0.40
codegen_flags: <defaults>
</compile_context>

<pallas_src>
import jax
import jax.numpy as jnp
from jax.experimental import pallas as pl
from jax.experimental.pallas import tpu as pltpu


_TARGET_TILE_BYTES = 4 * 1024 * 1024    # ~4 MiB per block buffer
_SINGLE_BLOCK_BYTES = 512 * 1024        # below this, a single block is fine
_VMEM_LIMIT_BYTES = 32 * 1024 * 1024    # 4 bufs x 4 MiB = 16 MiB << 32 MiB;
                                        # raises v5e's 16 MiB scoped default,
                                        # fits v7x's 64 MiB physical VMEM.


def _noise_scaler_kernel(s_ref, x_ref, o_ref):
    # s_ref: (1,) f32 in SMEM. exp() of a scalar is essentially free.
    factor = jnp.exp(10.0 * s_ref[0]).astype(x_ref.dtype)
    o_ref[...] = (x_ref[...] * factor).astype(o_ref.dtype)


def _round_up(v, m):
    return ((v + m - 1) // m) * m


def _cdiv(a, b):
    return -(-a // b)


def _choose_block_rows(rows, row_bytes, granule):
    """Pick block rows (pure Python, runs at trace time on static shapes)."""
    slab_bytes = rows * row_bytes
    # Tiny slabs: one full-extent block; pipeline overhead is irrelevant and
    # splitting below ~2 sublane granules is not meaningful.
    if slab_bytes <= _SINGLE_BLOCK_BYTES or rows <= 2 * granule:
        return rows

    # ~4 MiB per block, rounded to the dtype's sublane granule.
    br = max(granule, (_TARGET_TILE_BYTES // row_bytes) // granule * granule)
    br = min(br, rows)

    steps = _cdiv(rows, br)
    if steps < 2:
        # Never collapse a >512 KiB slab into a single block: a 1-step grid
        # disables the software pipeline and strands one v7x TensorCore.
        br = min(rows, max(granule, _round_up(_cdiv(rows, 2), granule)))
    elif steps % 2:
        # Prefer an even grid so v7x's two TCs split the work evenly.
        for cand_steps in (steps + 1, steps + 3):
            cand = max(granule, _round_up(_cdiv(rows, cand_steps), granule))
            if cand < br and _cdiv(rows, cand) % 2 == 0:
                br = cand
                break
    return br


def _scale_2d(x2d, scaler_f32):
    rows, width = x2d.shape
    itemsize = jnp.dtype(x2d.dtype).itemsize
    granule = max(8, 32 // itemsize)          # 8 f32 / 16 bf16 / 32 int8-fp8
    block_rows = _choose_block_rows(rows, width * itemsize, granule)
    grid = (_cdiv(rows, block_rows),)

    return pl.pallas_call(
        _noise_scaler_kernel,
        out_shape=jax.ShapeDtypeStruct((rows, width), x2d.dtype),
        grid_spec=pltpu.PrefetchScalarGridSpec(
            num_scalar_prefetch=0,
            grid=grid,
            in_specs=[
                pl.BlockSpec(memory_space=pltpu.MemorySpace.SMEM),   # scaler
                pl.BlockSpec((block_rows, width), lambda i: (i, 0)),  # x tile
            ],
            out_specs=pl.BlockSpec((block_rows, width), lambda i: (i, 0)),
        ),
        compiler_params=pltpu.CompilerParams(
            dimension_semantics=("parallel",),
            vmem_limit_bytes=_VMEM_LIMIT_BYTES,
        ),
    )(scaler_f32, x2d)


@jax.jit
def noise_scaler(x: jax.Array, scaler: jax.Array) -> jax.Array:
    """x: any-shaped array (e.g. NCHW). scaler: (1,) or 0-d f32 parameter."""
    orig_shape = x.shape
    flat = x.reshape(-1)
    n = flat.shape[0]
    scaler_f32 = jnp.asarray(scaler, jnp.float32).reshape((1,))

    # Widest lane-dense width (any multiple of 128) that exactly divides n.
    width = None
    for w in range(8192, 127, -128):
        if n % w == 0:
            width = w
            break

    if width is not None:
        out_flat = _scale_2d(flat.reshape(n // width, width), scaler_f32).reshape(-1)
    else:
        # n not a multiple of 128: kernel handles the aligned prefix; the
        # <128-element tail is finished with plain jnp (no full-array pad/slice).
        n_main = (n // 128) * 128
        factor = jnp.exp(10.0 * scaler_f32[0]).astype(flat.dtype)
        tail_out = flat[n_main:] * factor
        if n_main == 0:
            out_flat = tail_out
        else:
            main_out = _scale_2d(
                flat[:n_main].reshape(n_main // 128, 128), scaler_f32
            ).reshape(-1)
            out_flat = jnp.concatenate([main_out, tail_out])

    return out_flat.reshape(orig_shape)


if __name__ == "__main__":
    key = jax.random.PRNGKey(0)
    x = jax.random.normal(key, (2, 4, 16, 16), dtype=jnp.float32)  # NCHW

    # Deterministic parameter init matching nn.Parameter(torch.zeros(1)).
    scaler = jnp.zeros((1,), dtype=jnp.float32)

    y = noise_scaler(x, scaler)
    jax.block_until_ready(y)
    ref = x * jnp.exp(10.0 * scaler[0])
    assert y.shape == x.shape and y.dtype == x.dtype
    assert jnp.allclose(y, ref, atol=1e-6, rtol=1e-6)

    # Nonzero scaler to exercise the exp path.
    scaler2 = jnp.array([0.05], dtype=jnp.float32)
    y2 = noise_scaler(x, scaler2)
    jax.block_until_ready(y2)
    ref2 = x * jnp.exp(10.0 * scaler2[0])
    assert jnp.allclose(y2, ref2, atol=1e-5, rtol=1e-5)

    # Mid-size slab: wide-slab path (width=8192), split into a >=2-step grid.
    x3 = jax.random.normal(jax.random.PRNGKey(1), (2, 3, 128, 256), dtype=jnp.float32)
    y3 = noise_scaler(x3, scaler2)
    jax.block_until_ready(y3)
    ref3 = x3 * jnp.exp(10.0 * scaler2[0])
    assert y3.shape == x3.shape
    assert jnp.allclose(y3, ref3, atol=1e-5, rtol=1e-5)

    # Awkward size (not a multiple of 128): aligned-prefix kernel + jnp tail.
    x4 = jax.random.normal(jax.random.PRNGKey(2), (2, 3, 5, 7), dtype=jnp.float32)
    y4 = noise_scaler(x4, scaler2)
    jax.block_until_ready(y4)
    ref4 = x4 * jnp.exp(10.0 * scaler2[0])
    assert y4.shape == x4.shape
    assert jnp.allclose(y4, ref4, atol=1e-5, rtol=1e-5)

    print("KERNEL_OK")
</pallas_src>

<mosaic_0001>
module attributes {stable_mosaic.version = 11 : i64} {
  func.func @_noise_scaler_kernel(%arg0: i32, %arg1: memref<1xf32, #tpu.memory_space<smem>>, %arg2: memref<1x2048xf32, #tpu.memory_space<vmem>>, %arg3: memref<1x2048xf32, #tpu.memory_space<vmem>>) attributes {dimension_semantics = [#tpu.dimension_semantics<parallel>], iteration_bounds = array<i64: 1>, scalar_prefetch = 0 : i64, scratch_operands = 0 : i64, tpu.core_type = #tpu.core_type<tc>, window_params = [{transform_indices = @transform_0, window_bounds = array<i64: 1>}, {transform_indices = @transform_1, window_bounds = array<i64: 1, 2048>}, {transform_indices = @transform_2, window_bounds = array<i64: 1, 2048>}]} {
    %c0 = arith.constant 0 : index
    %0 = memref.load %arg1[%c0] : memref<1xf32, #tpu.memory_space<smem>>
    %cst = arith.constant 1.000000e+01 : f32
    %1 = arith.mulf %cst, %0 : f32
    %2 = math.exp %1 : f32
    %c0_0 = arith.constant 0 : index
    %c0_1 = arith.constant 0 : index
    %3 = vector.load %arg2[%c0_0, %c0_1] : memref<1x2048xf32, #tpu.memory_space<vmem>>, vector<1x2048xf32>
    %4 = vector.broadcast %2 : f32 to vector<1x2048xf32>
    %5 = arith.mulf %3, %4 : vector<1x2048xf32>
    %c0_2 = arith.constant 0 : index
    %c0_3 = arith.constant 0 : index
    %6 = vector.load %arg3[%c0_2, %c0_3] : memref<1x2048xf32, #tpu.memory_space<vmem>>, vector<1x2048xf32>
    tpu.vector_store %arg3[%c0_2, %c0_3], %5 {strides = array<i32>} : memref<1x2048xf32, #tpu.memory_space<vmem>>, vector<1x2048xf32>,
    return
  }
  func.func @transform_0(%arg0: i32) -> i32 {
    %c0_i32 = arith.constant 0 : i32
    %c0_i32_0 = arith.constant 0 : i32
    return %c0_i32 : i32
  }
  func.func @transform_1(%arg0: i32) -> (i32, i32) {
    %c0_i32 = arith.constant 0 : i32
    %c0_i32_0 = arith.constant 0 : i32
    return %arg0, %c0_i32 : i32, i32
  }
  func.func @transform_2(%arg0: i32) -> (i32, i32) {
    %c0_i32 = arith.constant 0 : i32
    %c0_i32_0 = arith.constant 0 : i32
    return %arg0, %c0_i32 : i32, i32
  }
}

</mosaic_0001>

<bundles_post_ra>
// kernel: noise_scaler.1
= control target key start
LH: loop header
LB: loop body
LE: loop exit
PB: predicated region body
PF: predicated region fallthrough
CT: control target
= control target key end

     0   :  { %s63_s0 = inlined_call_operand.<no memory space> [shape: f32[1], index: 0, kind: input, shape index: {}]   ;;  %s64_s1 = inlined_call_operand.vmem [shape: f32[1,2048], index: 1, kind: input, shape index: {}]   ;;  %s65_s2 = inlined_call_operand.vmem [shape: f32[1,2048], index: 2, kind: output, shape index: {}]  }
   0x1   :  { %s13_s11 = smul.f32 10.0, %s63_s0  ;;  %v18_v3 = vld [vmem:[%s64_s1] sm:$0xff]  ;;  %v19_v4 = vld [vmem:[%s64_s1 + $0x8] sm:$0xff] }
   0x3   :  { %v14_v0 = vstv %s13_s11 }
   0x4   :  { %v15_v1 = vmul.f32 1.442695, %v14_v0 }
   0x6   :  { %31 = vpow2.f32 %v15_v1 }
  0x13   :  { %v32_v2 = vpop.eup %31 }
  0x14   :  { %29 = vpush %v32_v2 }
  0x45   :  { %s30_s16 = spop %29 }
  0x46   :  { %v20_v5 = vstv %s30_s16 }
  0x47   :  { %v21_v6 = vmul.f32 %v20_v5, %v18_v3  ;;  %v22_v7 = vmul.f32 %v20_v5, %v19_v4 }
  0x49   :  { %23 = vst [vmem:[%s65_s2] sm:$0xff] %v21_v6  ;;  %24 = vst [vmem:[%s65_s2 + $0x8] sm:$0xff] %v22_v7 }

</bundles_post_ra>
